<compile_context>
chip_gen: v6e
topology: v6e:2x2x1
jax: 0.10.0
libtpu: 0.0.40
codegen_flags: <defaults>
</compile_context>

<pallas_src>
import jax
import jax.numpy as jnp
from jax.experimental import pallas as pl
from jax.experimental.pallas import tpu as pltpu

LEAK = 0.02


def _round_up(n, m):
    return ((n + m - 1) // m) * m


def _leaky_relu(x):
    # max(x, a*x) == LeakyReLU(a) for 0 < a < 1 (2 VPU ops, no compare+select).
    return jnp.maximum(x, LEAK * x)


# ---------------------------------------------------------------------------
# Kernel: fully fused 5-layer MLP on one batch tile.
# ---------------------------------------------------------------------------
def decoder_kernel(x_ref,
                   w1_ref, b1_ref,
                   w2_ref, b2_ref,
                   w3_ref, b3_ref,
                   w4_ref, b4_ref,
                   w5_ref, b5_ref,
                   o_ref):
    def layer(h, w_ref, b_ref):
        # Cast activations to the weight dtype (no-op when dtypes already
        # match) so bf16 weights drive the MXU in bf16; accumulate in f32.
        return jnp.dot(h.astype(w_ref.dtype), w_ref[...],
                       preferred_element_type=jnp.float32) + b_ref[...]

    h = x_ref[...]                                   # (tb, Hp), f32 or bf16
    h = _leaky_relu(layer(h, w1_ref, b1_ref))        # f32 from here on
    h = _leaky_relu(layer(h, w2_ref, b2_ref))
    h = _leaky_relu(layer(h, w3_ref, b3_ref))
    h = _leaky_relu(layer(h, w4_ref, b4_ref))
    o_ref[...] = jnp.tanh(layer(h, w5_ref, b5_ref)).astype(o_ref.dtype)


# ---------------------------------------------------------------------------
# Host-side parameter preparation: 128-lane zero padding, optional bf16 cast.
# ---------------------------------------------------------------------------
def _prepare_params(params, use_bf16):
    """Zero-pad every layer width (input of layer 0 and ALL outputs, incl. the
    final one) to a multiple of 128 lanes.  Exact: zero cols + zero bias give
    zero activations; LeakyReLU keeps zeros; the next layer's zero rows
    annihilate them; tanh(0)=0 for the final padded columns (sliced off)."""
    in_dims = [w.shape[0] for w, _ in params]
    out_dims = [w.shape[1] for w, _ in params]
    padded_in0 = _round_up(in_dims[0], 128)
    padded_out = [_round_up(d, 128) for d in out_dims]

    prepared = []
    for i, (w, b) in enumerate(params):
        w = jnp.asarray(w, jnp.float32)
        b = jnp.asarray(b, jnp.float32)
        rows_target = padded_in0 if i == 0 else padded_out[i - 1]
        if rows_target > w.shape[0]:
            w = jnp.pad(w, ((0, rows_target - w.shape[0]), (0, 0)))
        if padded_out[i] > w.shape[1]:
            pad = padded_out[i] - w.shape[1]
            w = jnp.pad(w, ((0, 0), (0, pad)))
            b = jnp.pad(b, ((0, 0), (0, pad)))
        if use_bf16:
            w = w.astype(jnp.bfloat16)        # padding zeros stay exact in bf16
        prepared.append((w, b))
    return prepared


# ---------------------------------------------------------------------------
# Wrapper
# ---------------------------------------------------------------------------
def decoder_client_emb(x, params, *, tb=1024, use_bf16=True):
    """x: (B, hidden_dim) f32. params: list of (W (in,out), b (1,out))."""
    x = jnp.asarray(x, jnp.float32)
    B, hidden_dim = x.shape
    data_dim = params[-1][0].shape[1]

    pparams = _prepare_params(params, use_bf16)
    Hp = pparams[0][0].shape[0]        # padded input feature width (mult of 128)
    Dp = pparams[-1][0].shape[1]       # padded output width (mult of 128)

    # ---- batch tiling -----------------------------------------------------
    Bp8 = _round_up(max(B, 1), 8)
    tb_cap = max(8, _round_up(int(tb), 8))
    if Bp8 <= tb_cap:
        # Whole batch fits in one tile; split it in two when possible so both
        # v7x TensorCores get a grid step (irrelevant on 1-TC v5e/v6e).
        tb_eff = _round_up(-(-Bp8 // 2), 8) if Bp8 >= 16 else Bp8
    else:
        tb_eff = tb_cap
    Bp = _round_up(Bp8, tb_eff)
    grid = (Bp // tb_eff,)

    # ---- input cast + single fused pad (batch rows + feature lanes) --------
    xd = x.astype(jnp.bfloat16) if use_bf16 else x
    pad_b, pad_h = Bp - B, Hp - hidden_dim
    if pad_b or pad_h:
        # One pad op covers both dims; the feature pad already forces a
        # rewrite of x, so batch padding adds no extra HBM pass.
        xd = jnp.pad(xd, ((0, pad_b), (0, pad_h)))

    # ---- BlockSpecs ---------------------------------------------------------
    # x/output tiled over batch; weights/biases are full-array blocks with a
    # constant index map (resident in VMEM, never re-DMA'd across steps).
    def full_spec(arr):
        nd = arr.ndim
        return pl.BlockSpec(arr.shape, lambda i, _nd=nd: (0,) * _nd)

    in_specs = [pl.BlockSpec((tb_eff, Hp), lambda i: (i, 0))]
    flat_params = []
    for w, b in pparams:
        in_specs.append(full_spec(w))
        in_specs.append(full_spec(b))
        flat_params.extend([w, b])
    out_spec = pl.BlockSpec((tb_eff, Dp), lambda i: (i, 0))

    # ---- VMEM budget (only matters if layer widths grow; v7x has 64 MiB) ----
    x_item = 2 if use_bf16 else 4
    param_bytes = sum(int(w.size) * w.dtype.itemsize + int(b.size) * b.dtype.itemsize
                      for w, b in pparams)
    widest = max(int(w.shape[1]) for w, _ in pparams)
    vmem_need = (2 * tb_eff * Hp * x_item      # double-buffered x tile
                 + 2 * tb_eff * Dp * 4         # double-buffered out tile
                 + 2 * param_bytes             # resident params (default 2 bufs)
                 + 3 * tb_eff * widest * 4)    # live f32 activations in the body
    vmem_limit = None
    if vmem_need > 16 * 1024 * 1024:
        vmem_limit = min(int(vmem_need * 1.25), 64 * 1024 * 1024)

    # ---- advisory cost estimate for the XLA scheduler -----------------------
    flops = 2 * Bp * sum(int(w.shape[0]) * int(w.shape[1]) for w, _ in pparams)
    bytes_accessed = (int(xd.size) * xd.dtype.itemsize
                      + param_bytes
                      + Bp * Dp * 4)
    cost = pl.CostEstimate(flops=flops,
                           transcendentals=Bp * Dp,
                           bytes_accessed=bytes_accessed)

    out = pl.pallas_call(
        decoder_kernel,
        out_shape=jax.ShapeDtypeStruct((Bp, Dp), jnp.float32),
        grid_spec=pltpu.PrefetchScalarGridSpec(
            num_scalar_prefetch=0,
            grid=grid,
            in_specs=in_specs,
            out_specs=out_spec,
        ),
        compiler_params=pltpu.CompilerParams(
            dimension_semantics=("parallel",),
            vmem_limit_bytes=vmem_limit),
        cost_estimate=cost,
    )(xd, *flat_params)

    return out[:B, :data_dim]


# ---------------------------------------------------------------------------
# Init + reference (pure JAX)
# ---------------------------------------------------------------------------
def init_params(key, hidden_dim, data_dim):
    """PyTorch-like default Linear init, weights stored (in, out)."""
    dims = [hidden_dim, 2 ** 6, 2 ** 8, 2 ** 8, 2 ** 6, data_dim]
    params = []
    for li, (fan_in, fan_out) in enumerate(zip(dims[:-1], dims[1:])):
        kw, kb = jax.random.split(jax.random.fold_in(key, li))
        bound = 1.0 / jnp.sqrt(float(fan_in))
        w = jax.random.uniform(kw, (fan_in, fan_out), jnp.float32, -bound, bound)
        b = jax.random.uniform(kb, (1, fan_out), jnp.float32, -bound, bound)
        params.append((w, b))
    return params


def reference_forward(x, params):
    h = x
    for i, (w, b) in enumerate(params):
        h = h @ w + b
        if i < len(params) - 1:
            h = jnp.where(h > 0, h, LEAK * h)
        else:
            h = jnp.tanh(h)
    return h


if __name__ == "__main__":
    hidden_dim, data_dim = 32, 16
    key = jax.random.PRNGKey(0)
    kx, kp, kx2 = jax.random.split(key, 3)
    params = init_params(kp, hidden_dim, data_dim)

    # --- f32 path (tight tolerance), B divisible by 8 ---
    B = 8
    x = jax.random.normal(kx, (B, hidden_dim), jnp.float32)
    ref = reference_forward(x, params)
    out_f32 = jax.block_until_ready(decoder_client_emb(x, params, use_bf16=False))
    assert out_f32.shape == (B, data_dim)
    assert jnp.allclose(out_f32, ref, atol=1e-5, rtol=1e-5), "f32 mismatch vs reference"

    # --- default bf16-weight/input path (f32 accumulation), loose tolerance ---
    out_bf16 = jax.block_until_ready(decoder_client_emb(x, params))
    assert out_bf16.shape == (B, data_dim)
    assert jnp.allclose(out_bf16, ref, atol=5e-2, rtol=5e-2), "bf16 mismatch vs reference"

    # --- ragged batch (exercises batch padding + a 2-step grid), f32 ---
    B2 = 10
    x2 = jax.random.normal(kx2, (B2, hidden_dim), jnp.float32)
    ref2 = reference_forward(x2, params)
    out2 = jax.block_until_ready(decoder_client_emb(x2, params, use_bf16=False))
    assert out2.shape == (B2, data_dim)
    assert jnp.allclose(out2, ref2, atol=1e-5, rtol=1e-5), "ragged-batch mismatch"

    print("KERNEL_OK")
</pallas_src>

<mosaic_0001>
module attributes {stable_mosaic.version = 11 : i64} {
  func.func @decoder_kernel(%arg0: i32, %arg1: memref<8x128xf32, #tpu.memory_space<vmem>>, %arg2: memref<128x128xf32, #tpu.memory_space<vmem>>, %arg3: memref<1x128xf32, #tpu.memory_space<vmem>>, %arg4: memref<128x256xf32, #tpu.memory_space<vmem>>, %arg5: memref<1x256xf32, #tpu.memory_space<vmem>>, %arg6: memref<256x256xf32, #tpu.memory_space<vmem>>, %arg7: memref<1x256xf32, #tpu.memory_space<vmem>>, %arg8: memref<256x128xf32, #tpu.memory_space<vmem>>, %arg9: memref<1x128xf32, #tpu.memory_space<vmem>>, %arg10: memref<128x128xf32, #tpu.memory_space<vmem>>, %arg11: memref<1x128xf32, #tpu.memory_space<vmem>>, %arg12: memref<8x128xf32, #tpu.memory_space<vmem>>) attributes {dimension_semantics = [#tpu.dimension_semantics<parallel>], iteration_bounds = array<i64: 1>, scalar_prefetch = 0 : i64, scratch_operands = 0 : i64, tpu.core_type = #tpu.core_type<tc>, window_params = [{transform_indices = @transform_0, window_bounds = array<i64: 8, 128>}, {pipeline_mode = #tpu.pipeline_mode<synchronous>, transform_indices = @transform_1, window_bounds = array<i64: 128, 128>}, {pipeline_mode = #tpu.pipeline_mode<synchronous>, transform_indices = @transform_2, window_bounds = array<i64: 1, 128>}, {pipeline_mode = #tpu.pipeline_mode<synchronous>, transform_indices = @transform_3, window_bounds = array<i64: 128, 256>}, {pipeline_mode = #tpu.pipeline_mode<synchronous>, transform_indices = @transform_4, window_bounds = array<i64: 1, 256>}, {pipeline_mode = #tpu.pipeline_mode<synchronous>, transform_indices = @transform_5, window_bounds = array<i64: 256, 256>}, {pipeline_mode = #tpu.pipeline_mode<synchronous>, transform_indices = @transform_6, window_bounds = array<i64: 1, 256>}, {pipeline_mode = #tpu.pipeline_mode<synchronous>, transform_indices = @transform_7, window_bounds = array<i64: 256, 128>}, {pipeline_mode = #tpu.pipeline_mode<synchronous>, transform_indices = @transform_8, window_bounds = array<i64: 1, 128>}, {pipeline_mode = #tpu.pipeline_mode<synchronous>, transform_indices = @transform_9, window_bounds = array<i64: 128, 128>}, {pipeline_mode = #tpu.pipeline_mode<synchronous>, transform_indices = @transform_10, window_bounds = array<i64: 1, 128>}, {transform_indices = @transform_11, window_bounds = array<i64: 8, 128>}]} {
    %c0 = arith.constant 0 : index
    %c0_0 = arith.constant 0 : index
    %0 = vector.load %arg1[%c0, %c0_0] : memref<8x128xf32, #tpu.memory_space<vmem>>, vector<8x128xf32>
    %c0_1 = arith.constant 0 : index
    %c0_2 = arith.constant 0 : index
    %1 = vector.load %arg2[%c0_1, %c0_2] : memref<128x128xf32, #tpu.memory_space<vmem>>, vector<128x128xf32>
    %cst = arith.constant dense<0.000000e+00> : vector<8x128xf32>
    %2 = tpu.matmul %0, %1, %cst {dimension_numbers = #tpu.dot_dimension_numbers<[1], [0], [0], [1], [0, 0, 1, 1], [], []>} : vector<8x128xf32>, vector<128x128xf32>, vector<8x128xf32> -> vector<8x128xf32>
    %c0_3 = arith.constant 0 : index
    %c0_4 = arith.constant 0 : index
    %3 = vector.load %arg3[%c0_3, %c0_4] : memref<1x128xf32, #tpu.memory_space<vmem>>, vector<1x128xf32>
    %4 = vector.broadcast %3 : vector<1x128xf32> to vector<8x128xf32>
    %5 = arith.addf %2, %4 : vector<8x128xf32>
    %cst_5 = arith.constant 2.000000e-02 : f32
    %6 = vector.broadcast %cst_5 : f32 to vector<8x128xf32>
    %7 = arith.mulf %6, %5 : vector<8x128xf32>
    %8 = arith.maximumf %5, %7 : vector<8x128xf32>
    %c0_6 = arith.constant 0 : index
    %c0_7 = arith.constant 0 : index
    %9 = vector.load %arg4[%c0_6, %c0_7] : memref<128x256xf32, #tpu.memory_space<vmem>>, vector<128x256xf32>
    %cst_8 = arith.constant dense<0.000000e+00> : vector<8x256xf32>
    %10 = tpu.matmul %8, %9, %cst_8 {dimension_numbers = #tpu.dot_dimension_numbers<[1], [0], [0], [1], [0, 0, 1, 1], [], []>} : vector<8x128xf32>, vector<128x256xf32>, vector<8x256xf32> -> vector<8x256xf32>
    %c0_9 = arith.constant 0 : index
    %c0_10 = arith.constant 0 : index
    %11 = vector.load %arg5[%c0_9, %c0_10] : memref<1x256xf32, #tpu.memory_space<vmem>>, vector<1x256xf32>
    %12 = vector.broadcast %11 : vector<1x256xf32> to vector<8x256xf32>
    %13 = arith.addf %10, %12 : vector<8x256xf32>
    %cst_11 = arith.constant 2.000000e-02 : f32
    %14 = vector.broadcast %cst_11 : f32 to vector<8x256xf32>
    %15 = arith.mulf %14, %13 : vector<8x256xf32>
    %16 = arith.maximumf %13, %15 : vector<8x256xf32>
    %c0_12 = arith.constant 0 : index
    %c0_13 = arith.constant 0 : index
    %17 = vector.load %arg6[%c0_12, %c0_13] : memref<256x256xf32, #tpu.memory_space<vmem>>, vector<256x256xf32>
    %cst_14 = arith.constant dense<0.000000e+00> : vector<8x256xf32>
    %18 = tpu.matmul %16, %17, %cst_14 {dimension_numbers = #tpu.dot_dimension_numbers<[1], [0], [0], [1], [0, 0, 1, 1], [], []>} : vector<8x256xf32>, vector<256x256xf32>, vector<8x256xf32> -> vector<8x256xf32>
    %c0_15 = arith.constant 0 : index
    %c0_16 = arith.constant 0 : index
    %19 = vector.load %arg7[%c0_15, %c0_16] : memref<1x256xf32, #tpu.memory_space<vmem>>, vector<1x256xf32>
    %20 = vector.broadcast %19 : vector<1x256xf32> to vector<8x256xf32>
    %21 = arith.addf %18, %20 : vector<8x256xf32>
    %cst_17 = arith.constant 2.000000e-02 : f32
    %22 = vector.broadcast %cst_17 : f32 to vector<8x256xf32>
    %23 = arith.mulf %22, %21 : vector<8x256xf32>
    %24 = arith.maximumf %21, %23 : vector<8x256xf32>
    %c0_18 = arith.constant 0 : index
    %c0_19 = arith.constant 0 : index
    %25 = vector.load %arg8[%c0_18, %c0_19] : memref<256x128xf32, #tpu.memory_space<vmem>>, vector<256x128xf32>
    %cst_20 = arith.constant dense<0.000000e+00> : vector<8x128xf32>
    %26 = tpu.matmul %24, %25, %cst_20 {dimension_numbers = #tpu.dot_dimension_numbers<[1], [0], [0], [1], [0, 0, 1, 1], [], []>} : vector<8x256xf32>, vector<256x128xf32>, vector<8x128xf32> -> vector<8x128xf32>
    %c0_21 = arith.constant 0 : index
    %c0_22 = arith.constant 0 : index
    %27 = vector.load %arg9[%c0_21, %c0_22] : memref<1x128xf32, #tpu.memory_space<vmem>>, vector<1x128xf32>
    %28 = vector.broadcast %27 : vector<1x128xf32> to vector<8x128xf32>
    %29 = arith.addf %26, %28 : vector<8x128xf32>
    %cst_23 = arith.constant 2.000000e-02 : f32
    %30 = vector.broadcast %cst_23 : f32 to vector<8x128xf32>
    %31 = arith.mulf %30, %29 : vector<8x128xf32>
    %32 = arith.maximumf %29, %31 : vector<8x128xf32>
    %c0_24 = arith.constant 0 : index
    %c0_25 = arith.constant 0 : index
    %33 = vector.load %arg10[%c0_24, %c0_25] : memref<128x128xf32, #tpu.memory_space<vmem>>, vector<128x128xf32>
    %cst_26 = arith.constant dense<0.000000e+00> : vector<8x128xf32>
    %34 = tpu.matmul %32, %33, %cst_26 {dimension_numbers = #tpu.dot_dimension_numbers<[1], [0], [0], [1], [0, 0, 1, 1], [], []>} : vector<8x128xf32>, vector<128x128xf32>, vector<8x128xf32> -> vector<8x128xf32>
    %c0_27 = arith.constant 0 : index
    %c0_28 = arith.constant 0 : index
    %35 = vector.load %arg11[%c0_27, %c0_28] : memref<1x128xf32, #tpu.memory_space<vmem>>, vector<1x128xf32>
    %36 = vector.broadcast %35 : vector<1x128xf32> to vector<8x128xf32>
    %37 = arith.addf %34, %36 : vector<8x128xf32>
    %38 = math.tanh %37 : vector<8x128xf32>
    %c0_29 = arith.constant 0 : index
    %c0_30 = arith.constant 0 : index
    %39 = vector.load %arg12[%c0_29, %c0_30] : memref<8x128xf32, #tpu.memory_space<vmem>>, vector<8x128xf32>
    tpu.vector_store %arg12[%c0_29, %c0_30], %38 {strides = array<i32>} : memref<8x128xf32, #tpu.memory_space<vmem>>, vector<8x128xf32>,
    return
  }
  func.func @transform_0(%arg0: i32) -> (i32, i32) {
    %c0_i32 = arith.constant 0 : i32
    %c0_i32_0 = arith.constant 0 : i32
    return %arg0, %c0_i32 : i32, i32
  }
  func.func @transform_1(%arg0: i32) -> (i32, i32) {
    %c0_i32 = arith.constant 0 : i32
    %c0_i32_0 = arith.constant 0 : i32
    %c0_i32_1 = arith.constant 0 : i32
    return %c0_i32, %c0_i32_0 : i32, i32
  }
  func.func @transform_2(%arg0: i32) -> (i32, i32) {
    %c0_i32 = arith.constant 0 : i32
    %c0_i32_0 = arith.constant 0 : i32
    %c0_i32_1 = arith.constant 0 : i32
    return %c0_i32, %c0_i32_0 : i32, i32
  }
  func.func @transform_3(%arg0: i32) -> (i32, i32) {
    %c0_i32 = arith.constant 0 : i32
    %c0_i32_0 = arith.constant 0 : i32
    %c0_i32_1 = arith.constant 0 : i32
    return %c0_i32, %c0_i32_0 : i32, i32
  }
  func.func @transform_4(%arg0: i32) -> (i32, i32) {
    %c0_i32 = arith.constant 0 : i32
    %c0_i32_0 = arith.constant 0 : i32
    %c0_i32_1 = arith.constant 0 : i32
    return %c0_i32, %c0_i32_0 : i32, i32
  }
  func.func @transform_5(%arg0: i32) -> (i32, i32) {
    %c0_i32 = arith.constant 0 : i32
    %c0_i32_0 = arith.constant 0 : i32
    %c0_i32_1 = arith.constant 0 : i32
    return %c0_i32, %c0_i32_0 : i32, i32
  }
  func.func @transform_6(%arg0: i32) -> (i32, i32) {
    %c0_i32 = arith.constant 0 : i32
    %c0_i32_0 = arith.constant 0 : i32
    %c0_i32_1 = arith.constant 0 : i32
    return %c0_i32, %c0_i32_0 : i32, i32
  }
  func.func @transform_7(%arg0: i32) -> (i32, i32) {
    %c0_i32 = arith.constant 0 : i32
    %c0_i32_0 = arith.constant 0 : i32
    %c0_i32_1 = arith.constant 0 : i32
    return %c0_i32, %c0_i32_0 : i32, i32
  }
  func.func @transform_8(%arg0: i32) -> (i32, i32) {
    %c0_i32 = arith.constant 0 : i32
    %c0_i32_0 = arith.constant 0 : i32
    %c0_i32_1 = arith.constant 0 : i32
    return %c0_i32, %c0_i32_0 : i32, i32
  }
  func.func @transform_9(%arg0: i32) -> (i32, i32) {
    %c0_i32 = arith.constant 0 : i32
    %c0_i32_0 = arith.constant 0 : i32
    %c0_i32_1 = arith.constant 0 : i32
    return %c0_i32, %c0_i32_0 : i32, i32
  }
  func.func @transform_10(%arg0: i32) -> (i32, i32) {
    %c0_i32 = arith.constant 0 : i32
    %c0_i32_0 = arith.constant 0 : i32
    %c0_i32_1 = arith.constant 0 : i32
    return %c0_i32, %c0_i32_0 : i32, i32
  }
  func.func @transform_11(%arg0: i32) -> (i32, i32) {
    %c0_i32 = arith.constant 0 : i32
    %c0_i32_0 = arith.constant 0 : i32
    return %arg0, %c0_i32 : i32, i32
  }
}

</mosaic_0001>

<bundles_post_ra>
// kernel: tpu_custom_call.1
= control target key start
LH: loop header
LB: loop body
LE: loop exit
PB: predicated region body
PF: predicated region fallthrough
CT: control target
= control target key end

     0   :  { %16 = vsyncpa [#allocation3], 0  ;;  %s1171_s0 = inlined_call_operand.hbm [shape: f32[8,128], index: 0, kind: input, shape index: {}]   ;;  %s1172_s1 = inlined_call_operand.hbm [shape: f32[128,128], index: 1, kind: input, shape index: {}]   ;;  %s1173_s2 = inlined_call_operand.vmem [shape: f32[1,128], index: 2, kind: input, shape index: {}]   ;;  %s1174_s3 = inlined_call_operand.hbm [shape: f32[128,256], index: 3, kind: input, shape index: {}]   ;;  %s1175_s4 = inlined_call_operand.vmem [shape: f32[1,256], index: 4, kind: input, shape index: {}]   ;;  %s1176_s5 = inlined_call_operand.hbm [shape: f32[256,256], index: 5, kind: input, shape index: {}]   ;;  %s1177_s6 = inlined_call_operand.vmem [shape: f32[1,256], index: 6, kind: input, shape index: {}]   ;;  %s1178_s7 = inlined_call_operand.hbm [shape: f32[256,128], index: 7, kind: input, shape index: {}]   ;;  %s1179_s8 = inlined_call_operand.vmem [shape: f32[1,128], index: 8, kind: input, shape index: {}]   ;;  %s1180_s9 = inlined_call_operand.hbm [shape: f32[128,128], index: 9, kind: input, shape index: {}]   ;;  %s1181_s10 = inlined_call_operand.vmem [shape: f32[1,128], index: 10, kind: input, shape index: {}]   ;;  %s1182_s11 = inlined_call_operand.hbm [shape: f32[8,128], index: 11, kind: output, shape index: {}]  }
   0x1   :  { %17 = vsyncpa [#allocation6], 0 }
   0x2   :  { %18 = vsyncpa [#allocation9], 0 }
   0x3   :  { %19 = vsyncpa [#allocation12], 0 }
   0x4   :  { %20 = vsyncpa [#allocation4], 0  ;;  %s1016_s17 = smov [#allocation5]  }
   0x5   :  { %s36_s18 = sshll.u32 %s1016_s17, 4  ;;  %s37_s18 = int_to_ptr.vmem [resolvable:$true] %s36_s18 }
   0x6   :  { %s874_s19 = scalar_lea.vmem %s37_s18, 2048  ;;  %p879_p1 = scmp.lt.s32.totalorder %s37_s18, %s37_s18 }
   0x7   :  { %p875_p0 = scmp.ne.s32.totalorder %s37_s18, %s874_s19  ;;  %p880_p2 = scmp.lt.s32.totalorder %s874_s19, %s874_s19 }
   0x9   :  { %p881_p3 = por %p880_p2, %p879_p1 }
   0xb   :  { %p882_p4 = pnand %p881_p3, %p875_p0 }
   0xd   :  { %885 = shalt.err (!%p882_p4)
}
   0xe   :  { %s1017_s20 = smov 128   ;;  %s1018_s21 = smov 8  }
   0xf   :  { %42 = dma.hbm_to_vmem [thread:$0]  %s1172_s1, 2048, %s37_s18, [#allocation6], %s1017_s20, %s1017_s20, %s1018_s21  }
  0x10   :  { %s1019_s24 = smov [#allocation8]   ;;  %s1020_s26 = smov [#allocation2]  }
  0x11   :  { %s64_s25 = sshll.u32 %s1019_s24, 4  ;;  %s27_s27 = sshll.u32 %s1020_s26, 4  ;;  %s65_s25 = int_to_ptr.vmem [resolvable:$true] %s64_s25  ;;  %s28_s27 = int_to_ptr.vmem [resolvable:$true] %s27_s27 }
  0x12   :  { %s894_s28 = scalar_lea.vmem %s65_s25, 8192  ;;  %p899_p6 = scmp.lt.s32.totalorder %s65_s25, %s65_s25 }
  0x13   :  { %p895_p5 = scmp.ne.s32.totalorder %s65_s25, %s894_s28  ;;  %p900_p7 = scmp.lt.s32.totalorder %s894_s28, %s894_s28 }
  0x15   :  { %p901_p8 = por %p900_p7, %p899_p6 }
  0x17   :  { %p902_p9 = pnand %p901_p8, %p895_p5 }
  0x19   :  { %905 = shalt.err (!%p902_p9)
}
  0x1a   :  { %s1021_s29 = smov 256   ;;  %s1022_s30 = smov 16  }
  0x1b   :  { %70 = dma.hbm_to_vmem [thread:$0]  %s1176_s5, 8192, %s65_s25, [#allocation9], %s1021_s29, %s1021_s29, %s1022_s30  }
  0x1c   :  { %s914_s1 = scalar_lea.vmem %s28_s27, 128  ;;  %p919_p11 = scmp.lt.s32.totalorder %s28_s27, %s28_s27 }
  0x1d   :  { %p915_p10 = scmp.ne.s32.totalorder %s28_s27, %s914_s1  ;;  %p920_p12 = scmp.lt.s32.totalorder %s914_s1, %s914_s1 }
  0x1f   :  { %p921_p13 = por %p920_p12, %p919_p11 }
  0x21   :  { %p922_p0 = pnand %p921_p13, %p915_p10 }
  0x23   :  { %925 = shalt.err (!%p922_p0)
}
  0x24   :  { %30 = dma.hbm_to_vmem [thread:$0]  %s1171_s0, 128, %s28_s27, [#allocation3]  }
  0x25   :  { %s1023_s16 = smov [#allocation7]   ;;  %s1024_s18 = smov [#allocation10]  }
  0x26   :  { %s50_s17 = sshll.u32 %s1023_s16, 4  ;;  %s78_s19 = sshll.u32 %s1024_s18, 4  ;;  %s51_s17 = int_to_ptr.vmem [resolvable:$true] %s50_s17  ;;  %s79_s19 = int_to_ptr.vmem [resolvable:$true] %s78_s19 }
  0x27   :  { %s934_s22 = scalar_lea.vmem %s51_s17, 4096  ;;  %p939_p2 = scmp.lt.s32.totalorder %s51_s17, %s51_s17 }
  0x28   :  { %p935_p1 = scmp.ne.s32.totalorder %s51_s17, %s934_s22  ;;  %p940_p3 = scmp.lt.s32.totalorder %s934_s22, %s934_s22 }
  0x2a   :  { %p941_p4 = por %p940_p3, %p939_p2 }
  0x2c   :  { %p942_p5 = pnand %p941_p4, %p935_p1 }
  0x2e   :  { %945 = shalt.err (!%p942_p5)
}
  0x2f   :  { %56 = dma.hbm_to_vmem [thread:$0]  %s1174_s3, 4096, %s51_s17, [#allocation6], %s1021_s29, %s1021_s29, %s1022_s30  }
  0x30   :  { %s954_s24 = scalar_lea.vmem %s79_s19, 4096  ;;  %p959_p7 = scmp.lt.s32.totalorder %s79_s19, %s79_s19 }
  0x31   :  { %p955_p6 = scmp.ne.s32.totalorder %s79_s19, %s954_s24  ;;  %p960_p8 = scmp.lt.s32.totalorder %s954_s24, %s954_s24 }
  0x33   :  { %p961_p9 = por %p960_p8, %p959_p7 }
  0x35   :  { %p962_p10 = pnand %p961_p9, %p955_p6 }
  0x37   :  { %965 = shalt.err (!%p962_p10)
}
  0x38   :  { %84 = dma.hbm_to_vmem [thread:$0]  %s1178_s7, 4096, %s79_s19, [#allocation9], %s1017_s20, %s1017_s20, %s1018_s21  }
  0x39   :  { %s1025_s26 = smov [#allocation11]  }
  0x3a   :  { %s92_s27 = sshll.u32 %s1025_s26, 4  ;;  %s93_s27 = int_to_ptr.vmem [resolvable:$true] %s92_s27 }
  0x3b   :  { %s974_s28 = scalar_lea.vmem %s93_s27, 2048  ;;  %p979_p12 = scmp.lt.s32.totalorder %s93_s27, %s93_s27 }
  0x3c   :  { %p975_p11 = scmp.ne.s32.totalorder %s93_s27, %s974_s28  ;;  %p980_p13 = scmp.lt.s32.totalorder %s974_s28, %s974_s28 }
  0x3e   :  { %p981_p0 = por %p980_p13, %p979_p12 }
  0x40   :  { %p982_p1 = pnand %p981_p0, %p975_p11 }
  0x42   :  { %985 = shalt.err (!%p982_p1)
}
  0x43   :  { %98 = dma.hbm_to_vmem [thread:$0]  %s1180_s9, 2048, %s93_s27, [#allocation12], %s1017_s20, %s1017_s20, %s1018_s21  }
  0x44   :  { %1006 = dma.done.wait [#allocation3], 128  }
  0x45   :  { %1007 = vsyncadd [#allocation3], 4294967168 }
  0x46   :  { %1008 = dma.done.wait [#allocation6], 6144  }
  0x47   :  { %1009 = vsyncadd [#allocation6], 4294961152 }
  0x48   :  { %1010 = dma.done.wait [#allocation9], 12288  }
  0x49   :  { %1011 = vsyncadd [#allocation9], 4294955008 }
  0x4a   :  { %1012 = dma.done.wait [#allocation12], 2048  }
  0x4b   :  { %1013 = vsyncadd [#allocation12], 4294965248  ;;  %v1026_v0 = vmov 0.0   ;;  %vm1027_vm0 = vmmov 0   ;;  %v135_v1 = vld [vmem:[#allocation5 + $0x78] sm:$0xff]  ;;  %v134_v2 = vld [vmem:[#allocation5 + $0x70] sm:$0xff] }
  0x4c   :  { %781 = vmatprep.subr.mxu0 %v1026_v0  ;;  %813 = vmatprep.mubr.msk.f32.mxu0 %vm1027_vm0, %v1026_v0  ;;  %v133_v3 = vld [vmem:[#allocation5 + $0x68] sm:$0xff]  ;;  %v132_v4 = vld [vmem:[#allocation5 + $0x60] sm:$0xff]  ;;  %v131_v5 = vld [vmem:[#allocation5 + $0x58] sm:$0xff]  ;;  %s1028_s1 = smov [#allocation13]  }
  0x4d   :  { %323 = vmatprep.mubr.f32.mxu1 %v1026_v0  ;;  %782 = vmatpush3.msra.mxu0 %v135_v1  ;;  %v246_v6 = vld [vmem:[#allocation7 + $0xf8] sm:$0xff]  ;;  %v245_v7 = vld [vmem:[#allocation7 + $0xf0] sm:$0xff]  ;;  %v244_v8 = vld [vmem:[#allocation7 + $0xe8] sm:$0xff]  ;;  %s697_s14 = sshll.u32 %s1028_s1, 4  ;;  %s698_s14 = int_to_ptr.vmem [resolvable:$true] %s697_s14 }
  0x4e   :  { %783 = vmatprep.subr.mxu0 %v1026_v0  ;;  %259 = vmatprep.subr.mxu1 %v246_v6  ;;  %v243_v9 = vld [vmem:[#allocation7 + $0xe0] sm:$0xff]  ;;  %v242_v10 = vld [vmem:[#allocation7 + $0xd8] sm:$0xff]  ;;  %v130_v11 = vld [vmem:[#allocation5 + $0x50] sm:$0xff]  ;;  %p991_p3 = scmp.lt.s32.totalorder %s698_s14, %s698_s14 }
  0x4f   :  { %784 = vmatpush3.msra.mxu0 %v134_v2  ;;  %260 = vmatpush1.msra.mxu1 %v245_v7  ;;  %v241_v12 = vld [vmem:[#allocation7 + $0xd0] sm:$0xff]  ;;  %v240_v13 = vld [vmem:[#allocation7 + $0xc8] sm:$0xff]  ;;  %v239_v15 = vld [vmem:[#allocation7 + $0xc0] sm:$0xff] }
  0x50   :  { %785 = vmatprep.subr.mxu0 %v1026_v0  ;;  %261 = vmatprep.subr.mxu1 %v244_v8  ;;  %v129_v14 = vld [vmem:[#allocation5 + $0x48] sm:$0xff]  ;;  %v238_v16 = vld [vmem:[#allocation7 + $0xb8] sm:$0xff]  ;;  %v128_v17 = vld [vmem:[#allocation5 + $0x40] sm:$0xff] }
  0x51   :  { %786 = vmatpush3.msra.mxu0 %v133_v3  ;;  %262 = vmatpush1.msra.mxu1 %v243_v9  ;;  %v237_v18 = vld [vmem:[#allocation7 + $0xb0] sm:$0xff]  ;;  %v236_v19 = vld [vmem:[#allocation7 + $0xa8] sm:$0xff]  ;;  %v127_v20 = vld [vmem:[#allocation5 + $0x38] sm:$0xff] }
  0x52   :  { %787 = vmatprep.subr.mxu0 %v1026_v0  ;;  %263 = vmatprep.subr.mxu1 %v242_v10  ;;  %v235_v21 = vld [vmem:[#allocation7 + $0xa0] sm:$0xff]  ;;  %v234_v22 = vld [vmem:[#allocation7 + $0x98] sm:$0xff]  ;;  %v126_v23 = vld [vmem:[#allocation5 + $0x30] sm:$0xff] }
  0x53   :  { %788 = vmatpush3.msra.mxu0 %v132_v4  ;;  %264 = vmatpush1.msra.mxu1 %v241_v12  ;;  %v233_v24 = vld [vmem:[#allocation7 + $0x90] sm:$0xff]  ;;  %v232_v25 = vld [vmem:[#allocation7 + $0x88] sm:$0xff]  ;;  %v231_v27 = vld [vmem:[#allocation7 + $0x80] sm:$0xff] }
  0x54   :  { %789 = vmatprep.subr.mxu0 %v1026_v0  ;;  %265 = vmatprep.subr.mxu1 %v240_v13  ;;  %v125_v26 = vld [vmem:[#allocation5 + $0x28] sm:$0xff]  ;;  %v230_v28 = vld [vmem:[#allocation7 + $0x78] sm:$0xff]  ;;  %v124_v29 = vld [vmem:[#allocation5 + $0x20] sm:$0xff] }
  0x55   :  { %790 = vmatpush3.msra.mxu0 %v131_v5  ;;  %266 = vmatpush1.msra.mxu1 %v239_v15  ;;  %v229_v30 = vld [vmem:[#allocation7 + $0x70] sm:$0xff]  ;;  %v228_v31 = vld [vmem:[#allocation7 + $0x68] sm:$0xff]  ;;  %v123_v32 = vld [vmem:[#allocation5 + $0x18] sm:$0xff] }
  0x56   :  { %791 = vmatprep.subr.mxu0 %v1026_v0  ;;  %267 = vmatprep.subr.mxu1 %v238_v16  ;;  %v227_v33 = vld [vmem:[#allocation7 + $0x60] sm:$0xff]  ;;  %v226_v34 = vld [vmem:[#allocation7 + $0x58] sm:$0xff]  ;;  %v122_v35 = vld [vmem:[#allocation5 + $0x10] sm:$0xff] }
  0x57   :  { %792 = vmatpush3.msra.mxu0 %v130_v11  ;;  %268 = vmatpush1.msra.mxu1 %v237_v18  ;;  %v225_v36 = vld [vmem:[#allocation7 + $0x50] sm:$0xff]  ;;  %v224_v37 = vld [vmem:[#allocation7 + $0x48] sm:$0xff]  ;;  %v223_v39 = vld [vmem:[#allocation7 + $0x40] sm:$0xff] }
  0x58   :  { %793 = vmatprep.subr.mxu0 %v1026_v0  ;;  %269 = vmatprep.subr.mxu1 %v236_v19  ;;  %v121_v38 = vld [vmem:[#allocation5 + $0x8] sm:$0xff]  ;;  %v222_v40 = vld [vmem:[#allocation7 + $0x38] sm:$0xff]  ;;  %v120_v41 = vld [vmem:[#allocation5] sm:$0xff] }
  0x59   :  { %794 = vmatpush3.msra.mxu0 %v129_v14  ;;  %270 = vmatpush1.msra.mxu1 %v235_v21  ;;  %v119_v42 = vld [vmem:[#allocation2] sm:$0xff]  ;;  %v221_v43 = vld [vmem:[#allocation7 + $0x30] sm:$0xff]  ;;  %v220_v44 = vld [vmem:[#allocation7 + $0x28] sm:$0xff] }
  0x5a   :  { %795 = vmatprep.subr.mxu0 %v1026_v0  ;;  %271 = vmatprep.subr.mxu1 %v234_v22  ;;  %v219_v45 = vld [vmem:[#allocation7 + $0x20] sm:$0xff]  ;;  %v218_v46 = vld [vmem:[#allocation7 + $0x18] sm:$0xff]  ;;  %v217_v47 = vld [vmem:[#allocation7 + $0x10] sm:$0xff] }
  0x5b   :  { %796 = vmatpush3.msra.mxu0 %v128_v17  ;;  %272 = vmatpush1.msra.mxu1 %v233_v24  ;;  %v216_v48 = vld [vmem:[#allocation7 + $0x8] sm:$0xff]  ;;  %v215_v49 = vld [vmem:[#allocation7] sm:$0xff]  ;;  %v365_v50 = vld [vmem:[#allocation8 + $0xf8] sm:$0xff] }
  0x5c   :  { %797 = vmatprep.subr.mxu0 %v1026_v0  ;;  %273 = vmatprep.subr.mxu1 %v232_v25  ;;  %v364_v51 = vld [vmem:[#allocation8 + $0xf0] sm:$0xff]  ;;  %v363_v52 = vld [vmem:[#allocation8 + $0xe8] sm:$0xff]  ;;  %v362_v53 = vld [vmem:[#allocation8 + $0xe0] sm:$0xff] }
  0x5d   :  { %798 = vmatpush3.msra.mxu0 %v127_v20  ;;  %274 = vmatpush1.msra.mxu1 %v231_v27  ;;  %v361_v54 = vld [vmem:[#allocation8 + $0xd8] sm:$0xff]  ;;  %v360_v55 = vld [vmem:[#allocation8 + $0xd0] sm:$0xff]  ;;  %v359_v56 = vld [vmem:[#allocation8 + $0xc8] sm:$0xff] }
  0x5e   :  { %799 = vmatprep.subr.mxu0 %v1026_v0  ;;  %275 = vmatprep.subr.mxu1 %v230_v28  ;;  %v358_v57 = vld [vmem:[#allocation8 + $0xc0] sm:$0xff]  ;;  %v357_v58 = vld [vmem:[#allocation8 + $0xb8] sm:$0xff]  ;;  %v356_v59 = vld [vmem:[#allocation8 + $0xb0] sm:$0xff] }
  0x5f   :  { %800 = vmatpush3.msra.mxu0 %v126_v23  ;;  %276 = vmatpush1.msra.mxu1 %v229_v30  ;;  %v355_v60 = vld [vmem:[#allocation8 + $0xa8] sm:$0xff]  ;;  %v354_v61 = vld [vmem:[#allocation8 + $0xa0] sm:$0xff]  ;;  %v353_v62 = vld [vmem:[#allocation8 + $0x98] sm:$0xff] }
  0x60   :  { %801 = vmatprep.subr.mxu0 %v1026_v0  ;;  %277 = vmatprep.subr.mxu1 %v228_v31  ;;  %v352_v63 = vld [vmem:[#allocation8 + $0x90] sm:$0xff]  ;;  %v351_v1 = vld [vmem:[#allocation8 + $0x88] sm:$0xff]  ;;  %v350_v2 = vld [vmem:[#allocation8 + $0x80] sm:$0xff] }
  0x61   :  { %802 = vmatpush3.msra.mxu0 %v125_v26  ;;  %278 = vmatpush1.msra.mxu1 %v227_v33  ;;  %v349_v3 = vld [vmem:[#allocation8 + $0x78] sm:$0xff]  ;;  %v348_v4 = vld [vmem:[#allocation8 + $0x70] sm:$0xff]  ;;  %v347_v5 = vld [vmem:[#allocation8 + $0x68] sm:$0xff] }
  0x62   :  { %803 = vmatprep.subr.mxu0 %v1026_v0  ;;  %279 = vmatprep.subr.mxu1 %v226_v34  ;;  %v346_v6 = vld [vmem:[#allocation8 + $0x60] sm:$0xff]  ;;  %v345_v7 = vld [vmem:[#allocation8 + $0x58] sm:$0xff]  ;;  %v344_v8 = vld [vmem:[#allocation8 + $0x50] sm:$0xff] }
  0x63   :  { %804 = vmatpush3.msra.mxu0 %v124_v29  ;;  %280 = vmatpush1.msra.mxu1 %v225_v36  ;;  %v343_v9 = vld [vmem:[#allocation8 + $0x48] sm:$0xff]  ;;  %v342_v10 = vld [vmem:[#allocation8 + $0x40] sm:$0xff]  ;;  %v341_v11 = vld [vmem:[#allocation8 + $0x38] sm:$0xff] }
  0x64   :  { %805 = vmatprep.subr.mxu0 %v1026_v0  ;;  %281 = vmatprep.subr.mxu1 %v224_v37  ;;  %v340_v12 = vld [vmem:[#allocation8 + $0x30] sm:$0xff]  ;;  %v339_v13 = vld [vmem:[#allocation8 + $0x28] sm:$0xff]  ;;  %v338_v14 = vld [vmem:[#allocation8 + $0x20] sm:$0xff] }
  0x65   :  { %806 = vmatpush3.msra.mxu0 %v123_v32  ;;  %282 = vmatpush1.msra.mxu1 %v223_v39  ;;  %v337_v15 = vld [vmem:[#allocation8 + $0x18] sm:$0xff]  ;;  %v336_v16 = vld [vmem:[#allocation8 + $0x10] sm:$0xff]  ;;  %v335_v17 = vld [vmem:[#allocation8 + $0x8] sm:$0xff] }
  0x66   :  { %807 = vmatprep.subr.mxu0 %v1026_v0  ;;  %283 = vmatprep.subr.mxu1 %v222_v40  ;;  %v334_v18 = vld [vmem:[#allocation8] sm:$0xff]  ;;  %v397_v19 = vld [vmem:[#allocation8 + $0x1f8] sm:$0xff]  ;;  %v396_v20 = vld [vmem:[#allocation8 + $0x1f0] sm:$0xff] }
  0x67   :  { %808 = vmatpush3.msra.mxu0 %v122_v35  ;;  %284 = vmatpush1.msra.mxu1 %v221_v43  ;;  %v395_v21 = vld [vmem:[#allocation8 + $0x1e8] sm:$0xff]  ;;  %v394_v22 = vld [vmem:[#allocation8 + $0x1e0] sm:$0xff]  ;;  %v393_v23 = vld [vmem:[#allocation8 + $0x1d8] sm:$0xff] }
  0x68   :  { %809 = vmatprep.subr.mxu0 %v1026_v0  ;;  %285 = vmatprep.subr.mxu1 %v220_v44  ;;  %v392_v24 = vld [vmem:[#allocation8 + $0x1d0] sm:$0xff]  ;;  %v391_v25 = vld [vmem:[#allocation8 + $0x1c8] sm:$0xff]  ;;  %v390_v26 = vld [vmem:[#allocation8 + $0x1c0] sm:$0xff] }
  0x69   :  { %810 = vmatpush3.msra.mxu0 %v121_v38  ;;  %286 = vmatpush1.msra.mxu1 %v219_v45  ;;  %v389_v27 = vld [vmem:[#allocation8 + $0x1b8] sm:$0xff]  ;;  %v388_v28 = vld [vmem:[#allocation8 + $0x1b0] sm:$0xff]  ;;  %v387_v29 = vld [vmem:[#allocation8 + $0x1a8] sm:$0xff] }
  0x6a   :  { %811 = vmatprep.subr.mxu0 %v1026_v0  ;;  %287 = vmatprep.subr.mxu1 %v218_v46  ;;  %v386_v30 = vld [vmem:[#allocation8 + $0x1a0] sm:$0xff]  ;;  %v385_v31 = vld [vmem:[#allocation8 + $0x198] sm:$0xff]  ;;  %v384_v32 = vld [vmem:[#allocation8 + $0x190] sm:$0xff] }
  0x6b   :  { %812 = vmatpush3.msra.mxu0 %v120_v41  ;;  %288 = vmatpush1.msra.mxu1 %v217_v47  ;;  %v383_v33 = vld [vmem:[#allocation8 + $0x188] sm:$0xff]  ;;  %v382_v34 = vld [vmem:[#allocation8 + $0x180] sm:$0xff]  ;;  %v381_v35 = vld [vmem:[#allocation8 + $0x178] sm:$0xff] }
  0x6c   :  { %814 = vmatmul.mubr.f32.vlgmr.msra.gmra.mxu0 %v119_v42  ;;  %289 = vmatprep.subr.mxu1 %v216_v48  ;;  %v380_v36 = vld [vmem:[#allocation8 + $0x170] sm:$0xff]  ;;  %v379_v37 = vld [vmem:[#allocation8 + $0x168] sm:$0xff]  ;;  %v378_v38 = vld [vmem:[#allocation8 + $0x160] sm:$0xff] }
  0x6d   :  { %290 = vmatpush1.msra.mxu1 %v215_v49  ;;  %410 = vmatprep.subr.mxu0 %v365_v50  ;;  %v377_v39 = vld [vmem:[#allocation8 + $0x158] sm:$0xff]  ;;  %v376_v40 = vld [vmem:[#allocation8 + $0x150] sm:$0xff]  ;;  %v375_v47 = vld [vmem:[#allocation8 + $0x148] sm:$0xff] }
  0x6e   :  { %411 = vmatpush1.msra.mxu0 %v364_v51  ;;  %v709_v41 = vld [vmem:[%s1173_s2] ss:$0 sm:$0xff]  ;;  %v374_v48 = vld [vmem:[#allocation8 + $0x140] sm:$0xff]  ;;  %v372_v50 = vld [vmem:[#allocation8 + $0x130] sm:$0xff] }
  0x6f   :  { %412 = vmatprep.subr.mxu0 %v363_v52  ;;  %v373_v49 = vld [vmem:[#allocation8 + $0x138] sm:$0xff]  ;;  %v371_v51 = vld [vmem:[#allocation8 + $0x128] sm:$0xff]  ;;  %v370_v52 = vld [vmem:[#allocation8 + $0x120] sm:$0xff] }
  0x70   :  { %413 = vmatpush1.msra.mxu0 %v362_v53  ;;  %v369_v53 = vld [vmem:[#allocation8 + $0x118] sm:$0xff] }
  0x71   :  { %414 = vmatprep.subr.mxu0 %v361_v54  ;;  %v368_v54 = vld [vmem:[#allocation8 + $0x110] sm:$0xff] }
  0x72   :  { %415 = vmatpush1.msra.mxu0 %v360_v55  ;;  %v367_v55 = vld [vmem:[#allocation8 + $0x108] sm:$0xff] }
  0x73   :  { %416 = vmatprep.subr.mxu0 %v359_v56  ;;  %v366_v56 = vld [vmem:[#allocation8 + $0x100] sm:$0xff] }
  0x74   :  { %417 = vmatpush1.msra.mxu0 %v358_v57  ;;  %v516_v57 = vld [vmem:[#allocation10 + $0xf8] sm:$0xff] }
  0x75   :  { %418 = vmatprep.subr.mxu0 %v357_v58  ;;  %v500_v58 = vld [vmem:[#allocation10 + $0x78] sm:$0xff]  ;;  %729 = vmatprep.subr.mxu1 %v516_v57  ;;  %v606_v57 = vld [vmem:[#allocation11 + $0x50] sm:$0xff] }
  0x76   :  { %419 = vmatpush1.msra.mxu0 %v356_v59  ;;  %v515_v59 = vld [vmem:[#allocation10 + $0xf0] sm:$0xff] }
  0x77   :  { %420 = vmatprep.subr.mxu0 %v355_v60  ;;  %v499_v60 = vld [vmem:[#allocation10 + $0x70] sm:$0xff] }
  0x78   :  { %421 = vmatpush1.msra.mxu0 %v354_v61  ;;  %v514_v61 = vld [vmem:[#allocation10 + $0xe8] sm:$0xff] }
  0x79   :  { %422 = vmatprep.subr.mxu0 %v353_v62  ;;  %v498_v62 = vld [vmem:[#allocation10 + $0x68] sm:$0xff] }
  0x7a   :  { %423 = vmatpush1.msra.mxu0 %v352_v63  ;;  %v513_v63 = vld [vmem:[#allocation10 + $0xe0] sm:$0xff] }
  0x7b   :  { %424 = vmatprep.subr.mxu0 %v351_v1  ;;  %v497_v1 = vld [vmem:[#allocation10 + $0x60] sm:$0xff] }
  0x7c   :  { %425 = vmatpush1.msra.mxu0 %v350_v2  ;;  %v512_v2 = vld [vmem:[#allocation10 + $0xd8] sm:$0xff] }
  0x7d   :  { %426 = vmatprep.subr.mxu0 %v349_v3  ;;  %v496_v3 = vld [vmem:[#allocation10 + $0x58] sm:$0xff] }
  0x7e   :  { %427 = vmatpush1.msra.mxu0 %v348_v4  ;;  %v511_v4 = vld [vmem:[#allocation10 + $0xd0] sm:$0xff] }
  0x7f   :  { %428 = vmatprep.subr.mxu0 %v347_v5  ;;  %v495_v5 = vld [vmem:[#allocation10 + $0x50] sm:$0xff] }
  0x80   :  { %429 = vmatpush1.msra.mxu0 %v346_v6  ;;  %v510_v6 = vld [vmem:[#allocation10 + $0xc8] sm:$0xff] }
  0x81   :  { %430 = vmatprep.subr.mxu0 %v345_v7  ;;  %v494_v7 = vld [vmem:[#allocation10 + $0x48] sm:$0xff] }
  0x82   :  { %431 = vmatpush1.msra.mxu0 %v344_v8  ;;  %v509_v8 = vld [vmem:[#allocation10 + $0xc0] sm:$0xff] }
  0x83   :  { %432 = vmatprep.subr.mxu0 %v343_v9  ;;  %v493_v9 = vld [vmem:[#allocation10 + $0x40] sm:$0xff] }
  0x84   :  { %433 = vmatpush1.msra.mxu0 %v342_v10  ;;  %v508_v10 = vld [vmem:[#allocation10 + $0xb8] sm:$0xff] }
  0x85   :  { %434 = vmatprep.subr.mxu0 %v341_v11  ;;  %v492_v11 = vld [vmem:[#allocation10 + $0x38] sm:$0xff] }
  0x86   :  { %435 = vmatpush1.msra.mxu0 %v340_v12  ;;  %v507_v12 = vld [vmem:[#allocation10 + $0xb0] sm:$0xff] }
  0x87   :  { %436 = vmatprep.subr.mxu0 %v339_v13  ;;  %v491_v13 = vld [vmem:[#allocation10 + $0x30] sm:$0xff] }
  0x88   :  { %437 = vmatpush1.msra.mxu0 %v338_v14  ;;  %v506_v14 = vld [vmem:[#allocation10 + $0xa8] sm:$0xff] }
  0x89   :  { %438 = vmatprep.subr.mxu0 %v337_v15  ;;  %v490_v15 = vld [vmem:[#allocation10 + $0x28] sm:$0xff] }
  0x8a   :  { %439 = vmatpush1.msra.mxu0 %v336_v16  ;;  %v249_v16 = vlaneseq }
  0x8b   :  { %440 = vmatprep.subr.mxu0 %v335_v17 }
  0x8c   :  { %441 = vmatpush1.msra.mxu0 %v334_v18  ;;  %v250_v17 = vshrl.u32 %v249_v16, 7 }
  0x8d   :  { %442 = vmatprep.subr.mxu0 %v397_v19  ;;  %v247_v19 = vld [vmem:[%s1175_s4] sm:$0x3] }
  0x8e   :  { %443 = vmatpush2.msra.mxu0 %v396_v20  ;;  %v251_v18 = vsub.s32 0, %v250_v17  ;;  %v255_v20 = vsub.s32 1, %v250_v17 }
  0x8f   :  { %444 = vmatprep.subr.mxu0 %v395_v21 }
  0x90   :  { %445 = vmatpush2.msra.mxu0 %v394_v22  ;;  %v252_v21 = vrot.slane %v247_v19, %v251_v18  ;;  %v256_v22 = vrot.slane %v247_v19, %v255_v20 }
  0x91   :  { %446 = vmatprep.subr.mxu0 %v393_v23 }
  0x92   :  { %447 = vmatpush2.msra.mxu0 %v392_v24 }
  0x93   :  { %448 = vmatprep.subr.mxu0 %v391_v25 }
  0x94   :  { %449 = vmatpush2.msra.mxu0 %v390_v26 }
  0x95   :  { %450 = vmatprep.subr.mxu0 %v389_v27 }
  0x96   :  { %451 = vmatpush2.msra.mxu0 %v388_v28 }
  0x97   :  { %452 = vmatprep.subr.mxu0 %v387_v29 }
  0x98   :  { %453 = vmatpush2.msra.mxu0 %v386_v30 }
  0x99   :  { %454 = vmatprep.subr.mxu0 %v385_v31  ;;  %v505_v31 = vld [vmem:[#allocation10 + $0xa0] sm:$0xff] }
  0x9a   :  { %455 = vmatpush2.msra.mxu0 %v384_v32  ;;  %v489_v32 = vld [vmem:[#allocation10 + $0x20] sm:$0xff] }
  0x9b   :  { %456 = vmatprep.subr.mxu0 %v383_v33  ;;  %v504_v33 = vld [vmem:[#allocation10 + $0x98] sm:$0xff] }
  0x9c   :  { %457 = vmatpush2.msra.mxu0 %v382_v34  ;;  %v488_v34 = vld [vmem:[#allocation10 + $0x18] sm:$0xff] }
  0x9d   :  { %458 = vmatprep.subr.mxu0 %v381_v35  ;;  %v503_v35 = vld [vmem:[#allocation10 + $0x90] sm:$0xff] }
  0x9e   :  { %459 = vmatpush2.msra.mxu0 %v380_v36  ;;  %v487_v36 = vld [vmem:[#allocation10 + $0x10] sm:$0xff] }
  0x9f   :  { %460 = vmatprep.subr.mxu0 %v379_v37  ;;  %v502_v37 = vld [vmem:[#allocation10 + $0x88] sm:$0xff] }
  0xa0   :  { %461 = vmatpush2.msra.mxu0 %v378_v38  ;;  %v486_v38 = vld [vmem:[#allocation10 + $0x8] sm:$0xff] }
  0xa1   :  { %462 = vmatprep.subr.mxu0 %v377_v39  ;;  %v501_v39 = vld [vmem:[#allocation10 + $0x80] sm:$0xff] }
  0xa2   :  { %463 = vmatpush2.msra.mxu0 %v376_v40  ;;  %v485_v40 = vld [vmem:[#allocation10] sm:$0xff] }
  0xa3   :  { %464 = vmatprep.subr.mxu0 %v375_v47 }
  0xa4   :  { %465 = vmatpush2.msra.mxu0 %v374_v48 }
  0xa5   :  { %466 = vmatprep.subr.mxu0 %v373_v49 }
  0xa6   :  { %467 = vmatpush2.msra.mxu0 %v372_v50 }
  0xa7   :  { %468 = vmatprep.subr.mxu0 %v371_v51 }
  0xa8   :  { %469 = vmatpush2.msra.mxu0 %v370_v52  ;;  %v611_v52 = vld [vmem:[#allocation11 + $0x78] sm:$0xff] }
  0xa9   :  { %470 = vmatprep.subr.mxu0 %v369_v53  ;;  %v610_v53 = vld [vmem:[#allocation11 + $0x70] sm:$0xff] }
  0xaa   :  { %471 = vmatpush2.msra.mxu0 %v368_v54  ;;  %v609_v54 = vld [vmem:[#allocation11 + $0x68] sm:$0xff] }
  0xab   :  { %472 = vmatprep.subr.mxu0 %v367_v55  ;;  %v608_v55 = vld [vmem:[#allocation11 + $0x60] sm:$0xff] }
  0xac   :  { %473 = vmatpush2.msra.mxu0 %v366_v56  ;;  %v607_v56 = vld [vmem:[#allocation11 + $0x58] sm:$0xff] }
 0x12c   :  { %v209_v42 = vpop.f32.mrf.mxu0 }
 0x12d   :  { %v210_v43 = vadd.f32 %v709_v41, %v209_v42  ;;  %v398_v41 = vld [vmem:[%s1177_s6] sm:$0x3] }
 0x12e   :  { %v815_v44 = vpop.f32.mrf.mxu0  ;;  %v403_v42 = vrot.slane %v398_v41, %v251_v18 }
 0x12f   :  { %v213_v45 = vmul.f32 0.02, %v210_v43 }
 0x131   :  { %v214_v46 = vmax.f32 %v210_v43, %v213_v45  ;;  %v407_v43 = vrot.slane %v398_v41, %v255_v20 }
 0x133   :  { %324 = vmatmul.mubr.f32.vlgmr.msra.gmra.mxu1 %v214_v46 }
 0x134   :  { %730 = vmatpush3.msra.mxu1 %v500_v58  ;;  %v605_v58 = vld [vmem:[#allocation11 + $0x48] sm:$0xff] }
 0x135   :  { %731 = vmatprep.subr.mxu1 %v515_v59  ;;  %v604_v59 = vld [vmem:[#allocation11 + $0x40] sm:$0xff] }
 0x136   :  { %732 = vmatpush3.msra.mxu1 %v499_v60  ;;  %v603_v60 = vld [vmem:[#allocation11 + $0x38] sm:$0xff] }
 0x137   :  { %733 = vmatprep.subr.mxu1 %v514_v61  ;;  %v602_v61 = vld [vmem:[#allocation11 + $0x30] sm:$0xff] }
 0x138   :  { %734 = vmatpush3.msra.mxu1 %v498_v62  ;;  %v601_v62 = vld [vmem:[#allocation11 + $0x28] sm:$0xff] }
 0x139   :  { %735 = vmatprep.subr.mxu1 %v513_v63  ;;  %v600_v63 = vld [vmem:[#allocation11 + $0x20] sm:$0xff] }
 0x13a   :  { %736 = vmatpush3.msra.mxu1 %v497_v1  ;;  %v599_v1 = vld [vmem:[#allocation11 + $0x18] sm:$0xff] }
 0x13b   :  { %737 = vmatprep.subr.mxu1 %v512_v2  ;;  %v598_v2 = vld [vmem:[#allocation11 + $0x10] sm:$0xff] }
 0x13c   :  { %738 = vmatpush3.msra.mxu1 %v496_v3  ;;  %v597_v3 = vld [vmem:[#allocation11 + $0x8] sm:$0xff] }
 0x13d   :  { %739 = vmatprep.subr.mxu1 %v511_v4  ;;  %v596_v4 = vld [vmem:[#allocation11] sm:$0xff] }
 0x13e   :  { %740 = vmatpush3.msra.mxu1 %v495_v5 }
 0x13f   :  { %741 = vmatprep.subr.mxu1 %v510_v6  ;;  %v710_v6 = vld [vmem:[%s1179_s8] ss:$0 sm:$0xff]  ;;  %s986_s8 = scalar_lea.vmem %s698_s14, 128 }
 0x140   :  { %742 = vmatpush3.msra.mxu1 %v494_v7  ;;  %p987_p2 = scmp.ne.s32.totalorder %s698_s14, %s986_s8  ;;  %p992_p4 = scmp.lt.s32.totalorder %s986_s8, %s986_s8 }
 0x141   :  { %743 = vmatprep.subr.mxu1 %v509_v8 }
 0x142   :  { %744 = vmatpush3.msra.mxu1 %v493_v9  ;;  %p993_p5 = por %p992_p4, %p991_p3 }
 0x143   :  { %745 = vmatprep.subr.mxu1 %v508_v10 }
 0x144   :  { %746 = vmatpush3.msra.mxu1 %v492_v11  ;;  %p994_p6 = pnand %p993_p5, %p987_p2 }
 0x145   :  { %747 = vmatprep.subr.mxu1 %v507_v12  ;;  %v711_v12 = vld [vmem:[%s1181_s10] ss:$0 sm:$0xff] }
 0x146   :  { %748 = vmatpush3.msra.mxu1 %v491_v13 }
 0x147   :  { %749 = vmatprep.subr.mxu1 %v506_v14 }
 0x148   :  { %750 = vmatpush3.msra.mxu1 %v490_v15 }
 0x149   :  { %751 = vmatprep.subr.mxu1 %v505_v31 }
 0x14a   :  { %752 = vmatpush3.msra.mxu1 %v489_v32 }
 0x14b   :  { %753 = vmatprep.subr.mxu1 %v504_v33 }
 0x14c   :  { %754 = vmatpush3.msra.mxu1 %v488_v34 }
 0x14d   :  { %755 = vmatprep.subr.mxu1 %v503_v35 }
 0x14e   :  { %756 = vmatpush3.msra.mxu1 %v487_v36 }
 0x14f   :  { %757 = vmatprep.subr.mxu1 %v502_v37 }
 0x150   :  { %758 = vmatpush3.msra.mxu1 %v486_v38 }
 0x151   :  { %759 = vmatprep.subr.mxu1 %v501_v39 }
 0x152   :  { %760 = vmatpush3.msra.mxu1 %v485_v40 }
 0x153   :  { %816 = vmatprep.subr.mxu1 %v1026_v0 }
 0x1f3   :  { %v325_v23 = vpop.f32.mrf.mxu1 }
 0x1f4   :  { %v326_v24 = vadd.f32 %v325_v23, %v252_v21 }
 0x1f5   :  { %v327_v25 = vpop.f32.mrf.mxu1 }
 0x1f6   :  { %v328_v26 = vadd.f32 %v327_v25, %v256_v22  ;;  %v330_v27 = vmul.f32 0.02, %v326_v24 }
 0x1f8   :  { %v331_v28 = vmul.f32 0.02, %v328_v26  ;;  %v332_v30 = vmax.f32 %v326_v24, %v330_v27 }
 0x1fa   :  { %v333_v29 = vmax.f32 %v328_v26, %v331_v28 }
 0x1fc   :  { %474 = vmatprep.mubr.f32.mxu0 %v333_v29 }
 0x1fd   :  { %475 = vmatmul.mubr.f32.vlgmr.msra.gmra.mxu0 %v332_v30 }
 0x2bd   :  { %v476_v44 = vpop.f32.mrf.mxu0 }
 0x2be   :  { %v477_v45 = vadd.f32 %v476_v44, %v403_v42 }
 0x2bf   :  { %v478_v46 = vpop.f32.mrf.mxu0 }
 0x2c0   :  { %v479_v47 = vadd.f32 %v478_v46, %v407_v43  ;;  %v481_v48 = vmul.f32 0.02, %v477_v45 }
 0x2c2   :  { %v482_v49 = vmul.f32 0.02, %v479_v47  ;;  %v483_v51 = vmax.f32 %v477_v45, %v481_v48 }
 0x2c4   :  { %v484_v50 = vmax.f32 %v479_v47, %v482_v49 }
 0x2c6   :  { %588 = vmatprep.mubr.f32.mxu1 %v484_v50 }
 0x2c7   :  { %589 = vmatmul.mubr.f32.vlgmr.msra.gmra.mxu1 %v483_v51 }
 0x2c8   :  { %817 = vmatpush3.msra.mxu1 %v611_v52  ;;  %848 = vmatprep.mubr.msk.f32.mxu1 %vm1027_vm0, %v1026_v0 }
 0x2c9   :  { %818 = vmatprep.subr.mxu1 %v1026_v0 }
 0x2ca   :  { %819 = vmatpush3.msra.mxu1 %v610_v53 }
 0x2cb   :  { %820 = vmatprep.subr.mxu1 %v1026_v0 }
 0x2cc   :  { %821 = vmatpush3.msra.mxu1 %v609_v54 }
 0x2cd   :  { %822 = vmatprep.subr.mxu1 %v1026_v0 }
 0x2ce   :  { %823 = vmatpush3.msra.mxu1 %v608_v55 }
 0x2cf   :  { %824 = vmatprep.subr.mxu1 %v1026_v0 }
 0x2d0   :  { %825 = vmatpush3.msra.mxu1 %v607_v56 }
 0x2d1   :  { %826 = vmatprep.subr.mxu1 %v1026_v0 }
 0x2d2   :  { %827 = vmatpush3.msra.mxu1 %v606_v57 }
 0x2d3   :  { %828 = vmatprep.subr.mxu1 %v1026_v0 }
 0x2d4   :  { %829 = vmatpush3.msra.mxu1 %v605_v58 }
 0x2d5   :  { %830 = vmatprep.subr.mxu1 %v1026_v0 }
 0x2d6   :  { %831 = vmatpush3.msra.mxu1 %v604_v59 }
 0x2d7   :  { %832 = vmatprep.subr.mxu1 %v1026_v0 }
 0x2d8   :  { %833 = vmatpush3.msra.mxu1 %v603_v60 }
 0x2d9   :  { %834 = vmatprep.subr.mxu1 %v1026_v0 }
 0x2da   :  { %835 = vmatpush3.msra.mxu1 %v602_v61 }
 0x2db   :  { %836 = vmatprep.subr.mxu1 %v1026_v0 }
 0x2dc   :  { %837 = vmatpush3.msra.mxu1 %v601_v62 }
 0x2dd   :  { %838 = vmatprep.subr.mxu1 %v1026_v0 }
 0x2de   :  { %839 = vmatpush3.msra.mxu1 %v600_v63 }
 0x2df   :  { %840 = vmatprep.subr.mxu1 %v1026_v0 }
 0x2e0   :  { %841 = vmatpush3.msra.mxu1 %v599_v1 }
 0x2e1   :  { %842 = vmatprep.subr.mxu1 %v1026_v0 }
 0x2e2   :  { %843 = vmatpush3.msra.mxu1 %v598_v2 }
 0x2e3   :  { %844 = vmatprep.subr.mxu1 %v1026_v0 }
 0x2e4   :  { %845 = vmatpush3.msra.mxu1 %v597_v3 }
 0x2e5   :  { %846 = vmatprep.subr.mxu1 %v1026_v0 }
 0x2e6   :  { %847 = vmatpush3.msra.mxu1 %v596_v4 }
 0x387   :  { %v761_v5 = vpop.f32.mrf.mxu1 }
 0x389   :  { %v762_v7 = vpop.f32.mrf.mxu1 }
 0x38a   :  { %v763_v8 = vadd.f32 %v762_v7, %v761_v5 }
 0x38c   :  { %v591_v9 = vadd.f32 %v763_v8, %v710_v6 }
 0x38e   :  { %v594_v10 = vmul.f32 0.02, %v591_v9 }
 0x390   :  { %v595_v11 = vmax.f32 %v591_v9, %v594_v10 }
 0x392   :  { %849 = vmatmul.mubr.f32.vlgmr.msra.gmra.mxu1 %v595_v11 }
 0x452   :  { %v685_v13 = vpop.f32.mrf.mxu1 }
 0x453   :  { %v686_v14 = vadd.f32 %v711_v12, %v685_v13 }
 0x454   :  { %v850_v0 = vpop.f32.mrf.mxu1 }
 0x455   :  { %864 = vtanh.f32 %v686_v14 }
 0x462   :  { %v865_v15 = vpop.eup %864 }
 0x463   :  { %690 = vst [vmem:[#allocation13] sm:$0xff] %v865_v15 }
 0x464   :  { %997 = shalt.err (!%p994_p6)
}
 0x465   :  { %700 = dma.vmem_to_hbm [thread:$0]  %s698_s14, 128, %s1182_s11, [#allocation4]  }
 0x466   :  { %1014 = dma.done.wait [#allocation4], 128  }
 0x467   :  { %1015 = vsyncadd [#allocation4], 4294967168 }
 0x468   :  { %704 = vsyncpa [#allocation3], 1 }
 0x469   :  { %705 = vsyncpa [#allocation6], 1 }
 0x46a   :  { %706 = vsyncpa [#allocation9], 1 }
 0x46b   :  { %707 = vsyncpa [#allocation12], 1 }
 0x46c   :  { %708 = vsyncpa [#allocation4], 1 }

</bundles_post_ra>
